<compile_context>
chip_gen: v6e
topology: v6e:2x2x1
jax: 0.10.0
libtpu: 0.0.40
codegen_flags: <defaults>
</compile_context>

<pallas_src>
import jax
import jax.numpy as jnp
from jax import lax
from jax.experimental import pallas as pl
from jax.experimental.pallas import tpu as pltpu


def _round8(v):
    return max(8, ((v + 7) // 8) * 8)


def rgcn_forward(x, att, basis, root, bias, adj,
                 *, tile=1024, compute_dtype=jnp.bfloat16):
    """Relational GCN forward.

    x:     (N, C_in)        node features
    att:   (R, B)           basis coefficients
    basis: (B, C_in, C_out) basis weight matrices
    root:  (C_in, C_out)    self-loop weight
    bias:  (C_out,)
    adj:   (R, N, N)        adj[r, dst, src] = sum of edge norms, per relation
    """
    N, C_in = x.shape
    R, B = att.shape
    C_out = basis.shape[-1]

    # ---- basis combination: tiny matmul, plain JAX (f32) ----
    w = (att @ basis.reshape(B, C_in * C_out)).reshape(R, C_in, C_out)

    # ---- padding / tiling choices ----
    c_pad = 128 * pl.cdiv(C_out, 128)          # lane-dense output / intermediates
    if N <= tile:
        # Small graph: still emit >= 2 dst blocks when possible so v7x's two
        # TensorCores both get work on the "parallel" dst axis.
        if _round8(N) >= 16:
            t_dst = _round8((N + 1) // 2)
            n_pad = 2 * t_dst
        else:
            t_dst = 8
            n_pad = 8
        t_src = n_pad                          # single src block (full lane dim)
    else:
        n_pad = tile * pl.cdiv(N, tile)
        t_dst = t_src = tile
    n_dst = n_pad // t_dst
    n_src = n_pad // t_src

    # ---- pad + cast operands (zero padding keeps the math exact) ----
    # adj is padded + cast in ONE pass (no padded-f32 intermediate).
    xp = jnp.zeros((n_pad, C_in), compute_dtype).at[:N, :].set(
        x.astype(compute_dtype))
    adjp = jnp.zeros((R, n_pad, n_pad), compute_dtype).at[:, :N, :N].set(
        adj.astype(compute_dtype))
    wp = jnp.zeros((R, C_in, c_pad), compute_dtype).at[:, :, :C_out].set(
        w.astype(compute_dtype))
    rootp = jnp.zeros((C_in, c_pad), compute_dtype).at[:, :C_out].set(
        root.astype(compute_dtype))
    biasp = jnp.zeros((1, c_pad), jnp.float32).at[0, :C_out].set(
        bias.astype(jnp.float32))

    # ---- per-tile sparsity remap (scalar prefetch -> SMEM) ----
    # flags[r, d, s] = adjacency tile (r, d, s) has at least one nonzero.
    nz = jnp.zeros((R, n_pad, n_pad), jnp.bool_).at[:, :N, :N].set(adj != 0)
    flags = nz.reshape(R, n_dst, t_dst, n_src, t_src).any(axis=(2, 4))

    # Grid iteration order is d (outer), r, s (inner).  Within each d-row
    # forward-fill the last nonzero (r, s) tile index; leading empty steps are
    # backfilled with the row's first nonzero tile (early prefetch, still no
    # extra DMA), fully empty rows fall back to (0, 0) (that tile is all-zero,
    # so the gated compute -- which fires only when remap == own -- adds 0).
    F = flags.transpose(1, 0, 2).reshape(n_dst, R * n_src)       # (n_dst, R*n_src)
    k_idx = jnp.arange(R * n_src, dtype=jnp.int32)
    ffill = lax.cummax(jnp.where(F, k_idx, jnp.int32(-1)), axis=1)
    first_nz = jnp.where(F.any(axis=1),
                         jnp.argmax(F, axis=1), 0).astype(jnp.int32)
    remap_k = jnp.where(ffill >= 0, ffill, first_nz[:, None])    # (n_dst, R*n_src)
    r_map = (remap_k // n_src).astype(jnp.int32).reshape(-1)     # 1-D -> SMEM
    s_map = (remap_k % n_src).astype(jnp.int32).reshape(-1)

    # ------------------------------------------------------------------ kernel
    def kernel(r_map_ref, s_map_ref, x_src_ref, x_dst_ref, w_ref, adj_ref,
               root_ref, bias_ref, o_ref):
        d = pl.program_id(0)   # dst-node tile (parallel)
        r = pl.program_id(1)   # relation      (reduction)
        s = pl.program_id(2)   # src-node tile (reduction)

        # init the VMEM-resident output block once per dst tile:
        # self-loop term x @ root plus bias (f32).
        @pl.when((r == 0) & (s == 0))
        def _():
            o_ref[...] = (jnp.dot(x_dst_ref[...], root_ref[...],
                                  preferred_element_type=jnp.float32)
                          + bias_ref[...])

        # gate: the adj index_map only returns our own block index when this
        # tile actually has nonzeros (otherwise it re-points at the previously
        # fetched tile and the DMA was skipped) -> compute iff remap == own.
        idx = (d * R + r) * n_src + s
        is_nonzero = (r_map_ref[idx] == r) & (s_map_ref[idx] == s)

        @pl.when(is_nonzero)
        def _():
            # per-relation feature transform for this src tile (recomputed per
            # dst tile: extra MXU cost ~ C_in / t_dst of the adj contraction,
            # free filler while the kernel is HBM-bound).
            h = jnp.dot(x_src_ref[...], w_ref[0],
                        preferred_element_type=jnp.float32
                        ).astype(compute_dtype)
            # scatter-sum to destinations == adj-tile @ h, f32 accumulation
            # directly into the output block.
            o_ref[...] += jnp.dot(adj_ref[0], h,
                                  preferred_element_type=jnp.float32)

    def adj_index_map(d, r, s, rmap, smap):
        i = (d * R + r) * n_src + s
        # empty tile -> previously fetched nonzero tile's index => DMA skipped.
        return (rmap[i], d, smap[i])

    grid_spec = pltpu.PrefetchScalarGridSpec(
        num_scalar_prefetch=2,                 # r_map, s_map -> SMEM
        grid=(n_dst, R, n_src),
        in_specs=[
            pl.BlockSpec((t_src, C_in), lambda d, r, s, rm, sm: (s, 0)),       # x (src)
            pl.BlockSpec((t_dst, C_in), lambda d, r, s, rm, sm: (d, 0)),       # x (dst)
            pl.BlockSpec((1, C_in, c_pad), lambda d, r, s, rm, sm: (r, 0, 0)),  # w[r]
            pl.BlockSpec((1, t_dst, t_src), adj_index_map),                     # adj tile
            pl.BlockSpec((C_in, c_pad), lambda d, r, s, rm, sm: (0, 0)),       # root
            pl.BlockSpec((1, c_pad), lambda d, r, s, rm, sm: (0, 0)),          # bias
        ],
        out_specs=pl.BlockSpec((t_dst, c_pad), lambda d, r, s, rm, sm: (d, 0)),
    )

    # VMEM budget estimate (double-buffered inputs + resident output block),
    # with headroom; capped safely below v7x's 64 MiB physical VMEM.
    est = (2 * t_dst * t_src * 2                       # adj (bf16, double buf)
           + 2 * t_src * C_in * 2 + 2 * t_dst * C_in * 2   # x src/dst
           + 2 * C_in * c_pad * 2                      # w
           + 2 * t_dst * c_pad * 4                     # output block
           + C_in * c_pad * 2 + 2 * c_pad * 4)         # root, bias
    vmem_limit = int(min(max(2 * est, 32 * 1024 * 1024), 60 * 1024 * 1024))

    out_pad = pl.pallas_call(
        kernel,
        out_shape=jax.ShapeDtypeStruct((n_pad, c_pad), jnp.float32),
        grid_spec=grid_spec,
        compiler_params=pltpu.CompilerParams(
            dimension_semantics=("parallel", "arbitrary", "arbitrary"),
            vmem_limit_bytes=vmem_limit),
    )(r_map, s_map, xp, xp, wp, adjp, rootp, biasp)

    return out_pad[:N, :C_out].astype(x.dtype)


if __name__ == "__main__":
    # Small synthetic problem (consistent with the module's constructor shapes)
    N = 16            # nodes
    E = 80            # edges
    C_in = 16         # in_channels
    C_out = 8         # out_channels
    R = 4             # num_relations
    B = 2             # num_bases

    key = jax.random.PRNGKey(0)
    k_x, k_basis, k_att, k_root, k_bias, k_src, k_dst, k_typ, k_nrm = \
        jax.random.split(key, 9)

    # Deterministic parameter init, mirroring reset_parameters():
    # uniform(-1/sqrt(num_bases*in_channels), +1/sqrt(...))
    bound = 1.0 / (B * C_in) ** 0.5
    basis = jax.random.uniform(k_basis, (B, C_in, C_out), jnp.float32, -bound, bound)
    att   = jax.random.uniform(k_att,   (R, B),           jnp.float32, -bound, bound)
    root  = jax.random.uniform(k_root,  (C_in, C_out),    jnp.float32, -bound, bound)
    bias  = jax.random.uniform(k_bias,  (C_out,),         jnp.float32, -bound, bound)

    # Node features and a deterministic synthetic graph (src, dst, type, norm)
    x     = jax.random.normal(k_x, (N, C_in), jnp.float32)
    src   = jax.random.randint(k_src, (E,), 0, N)
    dst   = jax.random.randint(k_dst, (E,), 0, N)
    etype = jax.random.randint(k_typ, (E,), 0, R)
    norm  = jax.random.uniform(k_nrm, (E,), jnp.float32, 0.1, 1.0)

    # Dense per-relation aggregation operator: adj[r, dst, src] += norm
    # (graph-structure prep / glue; the matmuls live in the Pallas kernel)
    adj = jnp.zeros((R, N, N), jnp.float32).at[etype, dst, src].add(norm)

    out = rgcn_forward(x, att, basis, root, bias, adj)
    out = jax.block_until_ready(out)

    # Pure-JAX f32 reference (edge-level, mirrors the PyTorch message/reduce path)
    w_ref = (att @ basis.reshape(B, -1)).reshape(R, C_in, C_out)
    m = jnp.einsum('ec,eco->eo', x[src], w_ref[etype]) * norm[:, None]
    agg = jnp.zeros((N, C_out), jnp.float32).at[dst].add(m)
    ref = agg + x @ root + bias

    assert out.shape == (N, C_out)
    err = float(jnp.max(jnp.abs(out - ref)))
    # kernel streams operands as bf16 with f32 accumulation -> bf16-level tol
    assert jnp.allclose(out, ref, rtol=3e-2, atol=3e-2), f"max err {err}"
    print("KERNEL_OK")
</pallas_src>

<mosaic_0001>
module attributes {stable_mosaic.version = 11 : i64} {
  func.func @kernel(%arg0: i32, %arg1: i32, %arg2: i32, %arg3: memref<8xi32, #tpu.memory_space<smem>>, %arg4: memref<8xi32, #tpu.memory_space<smem>>, %arg5: memref<16x16xbf16, #tpu.memory_space<vmem>>, %arg6: memref<8x16xbf16, #tpu.memory_space<vmem>>, %arg7: memref<1x16x128xbf16, #tpu.memory_space<vmem>>, %arg8: memref<1x8x16xbf16, #tpu.memory_space<vmem>>, %arg9: memref<16x128xbf16, #tpu.memory_space<vmem>>, %arg10: memref<1x128xf32, #tpu.memory_space<vmem>>, %arg11: memref<8x128xf32, #tpu.memory_space<vmem>>) attributes {dimension_semantics = [#tpu.dimension_semantics<parallel>, #tpu.dimension_semantics<arbitrary>, #tpu.dimension_semantics<arbitrary>], iteration_bounds = array<i64: 2, 4, 1>, scalar_prefetch = 2 : i64, scratch_operands = 0 : i64, tpu.core_type = #tpu.core_type<tc>, window_params = [{transform_indices = @transform_0, window_bounds = array<i64: 16, 16>}, {transform_indices = @transform_1, window_bounds = array<i64: 8, 16>}, {transform_indices = @transform_2, window_bounds = array<i64: 1, 16, 128>}, {transform_indices = @transform_3, window_bounds = array<i64: 1, 8, 16>}, {pipeline_mode = #tpu.pipeline_mode<synchronous>, transform_indices = @transform_4, window_bounds = array<i64: 16, 128>}, {pipeline_mode = #tpu.pipeline_mode<synchronous>, transform_indices = @transform_5, window_bounds = array<i64: 1, 128>}, {transform_indices = @transform_6, window_bounds = array<i64: 8, 128>}]} {
    %c0_i32 = arith.constant 0 : i32
    %0 = arith.cmpi eq, %arg1, %c0_i32 : i32
    %c0_i32_0 = arith.constant 0 : i32
    %1 = arith.cmpi eq, %arg2, %c0_i32_0 : i32
    %2 = arith.andi %0, %1 : i1
    %3 = arith.extui %2 : i1 to i32
    %c0_i32_1 = arith.constant 0 : i32
    %4 = arith.cmpi ne, %3, %c0_i32_1 : i32
    scf.if %4 {
      %c0 = arith.constant 0 : index
      %c0_3 = arith.constant 0 : index
      %18 = vector.load %arg6[%c0, %c0_3] : memref<8x16xbf16, #tpu.memory_space<vmem>>, vector<8x16xbf16>
      %c0_4 = arith.constant 0 : index
      %c0_5 = arith.constant 0 : index
      %19 = vector.load %arg9[%c0_4, %c0_5] : memref<16x128xbf16, #tpu.memory_space<vmem>>, vector<16x128xbf16>
      %cst = arith.constant dense<0.000000e+00> : vector<8x128xf32>
      %20 = tpu.matmul %18, %19, %cst {dimension_numbers = #tpu.dot_dimension_numbers<[1], [0], [0], [1], [0, 0, 1, 1], [], []>} : vector<8x16xbf16>, vector<16x128xbf16>, vector<8x128xf32> -> vector<8x128xf32>
      %c0_6 = arith.constant 0 : index
      %c0_7 = arith.constant 0 : index
      %21 = vector.load %arg10[%c0_6, %c0_7] : memref<1x128xf32, #tpu.memory_space<vmem>>, vector<1x128xf32>
      %22 = vector.broadcast %21 : vector<1x128xf32> to vector<8x128xf32>
      %23 = arith.addf %20, %22 : vector<8x128xf32>
      %c0_8 = arith.constant 0 : index
      %c0_9 = arith.constant 0 : index
      %24 = vector.load %arg11[%c0_8, %c0_9] : memref<8x128xf32, #tpu.memory_space<vmem>>, vector<8x128xf32>
      tpu.vector_store %arg11[%c0_8, %c0_9], %23 {strides = array<i32>} : memref<8x128xf32, #tpu.memory_space<vmem>>, vector<8x128xf32>,
    } else {
    }
    %c4_i32 = arith.constant 4 : i32
    %5 = arith.muli %arg0, %c4_i32 : i32
    %6 = arith.addi %5, %arg1 : i32
    %c1_i32 = arith.constant 1 : i32
    %7 = arith.muli %6, %c1_i32 : i32
    %8 = arith.addi %7, %arg2 : i32
    %9 = arith.index_cast %8 : i32 to index
    %10 = memref.load %arg3[%9] : memref<8xi32, #tpu.memory_space<smem>>
    %11 = arith.cmpi eq, %10, %arg1 : i32
    %12 = arith.index_cast %8 : i32 to index
    %13 = memref.load %arg4[%12] : memref<8xi32, #tpu.memory_space<smem>>
    %14 = arith.cmpi eq, %13, %arg2 : i32
    %15 = arith.andi %11, %14 : i1
    %16 = arith.extui %15 : i1 to i32
    %c0_i32_2 = arith.constant 0 : i32
    %17 = arith.cmpi ne, %16, %c0_i32_2 : i32
    scf.if %17 {
      %c0 = arith.constant 0 : index
      %c0_3 = arith.constant 0 : index
      %18 = vector.load %arg5[%c0, %c0_3] : memref<16x16xbf16, #tpu.memory_space<vmem>>, vector<16x16xbf16>
      %c0_4 = arith.constant 0 : index
      %c0_5 = arith.constant 0 : index
      %c0_6 = arith.constant 0 : index
      %19 = vector.load %arg7[%c0_4, %c0_5, %c0_6] : memref<1x16x128xbf16, #tpu.memory_space<vmem>>, vector<1x16x128xbf16>
      %20 = vector.shape_cast %19 : vector<1x16x128xbf16> to vector<16x128xbf16>
      %cst = arith.constant dense<0.000000e+00> : vector<16x128xf32>
      %21 = tpu.matmul %18, %20, %cst {dimension_numbers = #tpu.dot_dimension_numbers<[1], [0], [0], [1], [0, 0, 1, 1], [], []>} : vector<16x16xbf16>, vector<16x128xbf16>, vector<16x128xf32> -> vector<16x128xf32>
      %22 = arith.truncf %21 : vector<16x128xf32> to vector<16x128xbf16>
      %c0_7 = arith.constant 0 : index
      %c0_8 = arith.constant 0 : index
      %23 = vector.load %arg11[%c0_7, %c0_8] : memref<8x128xf32, #tpu.memory_space<vmem>>, vector<8x128xf32>
      %c0_9 = arith.constant 0 : index
      %c0_10 = arith.constant 0 : index
      %c0_11 = arith.constant 0 : index
      %24 = vector.load %arg8[%c0_9, %c0_10, %c0_11] : memref<1x8x16xbf16, #tpu.memory_space<vmem>>, vector<1x8x16xbf16>
      %25 = vector.shape_cast %24 : vector<1x8x16xbf16> to vector<8x16xbf16>
      %cst_12 = arith.constant dense<0.000000e+00> : vector<8x128xf32>
      %26 = tpu.matmul %25, %22, %cst_12 {dimension_numbers = #tpu.dot_dimension_numbers<[1], [0], [0], [1], [0, 0, 1, 1], [], []>} : vector<8x16xbf16>, vector<16x128xbf16>, vector<8x128xf32> -> vector<8x128xf32>
      %27 = arith.addf %23, %26 : vector<8x128xf32>
      %c0_13 = arith.constant 0 : index
      %c0_14 = arith.constant 0 : index
      %28 = vector.load %arg11[%c0_13, %c0_14] : memref<8x128xf32, #tpu.memory_space<vmem>>, vector<8x128xf32>
      tpu.vector_store %arg11[%c0_13, %c0_14], %27 {strides = array<i32>} : memref<8x128xf32, #tpu.memory_space<vmem>>, vector<8x128xf32>,
    } else {
    }
    return
  }
  func.func @transform_0(%arg0: i32, %arg1: i32, %arg2: i32, %arg3: memref<8xi32, #tpu.memory_space<smem>>, %arg4: memref<8xi32, #tpu.memory_space<smem>>) -> (i32, i32) {
    %c0_i32 = arith.constant 0 : i32
    %c0_i32_0 = arith.constant 0 : i32
    return %arg2, %c0_i32 : i32, i32
  }
  func.func @transform_1(%arg0: i32, %arg1: i32, %arg2: i32, %arg3: memref<8xi32, #tpu.memory_space<smem>>, %arg4: memref<8xi32, #tpu.memory_space<smem>>) -> (i32, i32) {
    %c0_i32 = arith.constant 0 : i32
    %c0_i32_0 = arith.constant 0 : i32
    return %arg0, %c0_i32 : i32, i32
  }
  func.func @transform_2(%arg0: i32, %arg1: i32, %arg2: i32, %arg3: memref<8xi32, #tpu.memory_space<smem>>, %arg4: memref<8xi32, #tpu.memory_space<smem>>) -> (i32, i32, i32) {
    %c0_i32 = arith.constant 0 : i32
    %c0_i32_0 = arith.constant 0 : i32
    %c0_i32_1 = arith.constant 0 : i32
    return %arg1, %c0_i32, %c0_i32_0 : i32, i32, i32
  }
  func.func @transform_3(%arg0: i32, %arg1: i32, %arg2: i32, %arg3: memref<8xi32, #tpu.memory_space<smem>>, %arg4: memref<8xi32, #tpu.memory_space<smem>>) -> (i32, i32, i32) {
    %c4_i32 = arith.constant 4 : i32
    %0 = arith.muli %arg0, %c4_i32 : i32
    %1 = arith.addi %0, %arg1 : i32
    %c1_i32 = arith.constant 1 : i32
    %2 = arith.muli %1, %c1_i32 : i32
    %3 = arith.addi %2, %arg2 : i32
    %4 = arith.index_cast %3 : i32 to index
    %5 = memref.load %arg3[%4] : memref<8xi32, #tpu.memory_space<smem>>
    %6 = arith.index_cast %3 : i32 to index
    %7 = memref.load %arg4[%6] : memref<8xi32, #tpu.memory_space<smem>>
    %c0_i32 = arith.constant 0 : i32
    return %5, %arg0, %7 : i32, i32, i32
  }
  func.func @transform_4(%arg0: i32, %arg1: i32, %arg2: i32, %arg3: memref<8xi32, #tpu.memory_space<smem>>, %arg4: memref<8xi32, #tpu.memory_space<smem>>) -> (i32, i32) {
    %c0_i32 = arith.constant 0 : i32
    %c0_i32_0 = arith.constant 0 : i32
    %c0_i32_1 = arith.constant 0 : i32
    return %c0_i32, %c0_i32_0 : i32, i32
  }
  func.func @transform_5(%arg0: i32, %arg1: i32, %arg2: i32, %arg3: memref<8xi32, #tpu.memory_space<smem>>, %arg4: memref<8xi32, #tpu.memory_space<smem>>) -> (i32, i32) {
    %c0_i32 = arith.constant 0 : i32
    %c0_i32_0 = arith.constant 0 : i32
    %c0_i32_1 = arith.constant 0 : i32
    return %c0_i32, %c0_i32_0 : i32, i32
  }
  func.func @transform_6(%arg0: i32, %arg1: i32, %arg2: i32, %arg3: memref<8xi32, #tpu.memory_space<smem>>, %arg4: memref<8xi32, #tpu.memory_space<smem>>) -> (i32, i32) {
    %c0_i32 = arith.constant 0 : i32
    %c0_i32_0 = arith.constant 0 : i32
    return %arg0, %c0_i32 : i32, i32
  }
}

</mosaic_0001>

<bundles_post_ra>
// kernel: tpu_custom_call.1
= control target key start
LH: loop header
LB: loop body
LE: loop exit
PB: predicated region body
PF: predicated region fallthrough
CT: control target
= control target key end

     0   :  { %s1283_s27 = smov [#allocation3]   ;;  %s1759_s0 = inlined_call_operand.hbm [shape: s32[8], index: 0, kind: input, shape index: {}]   ;;  %s1760_s2 = inlined_call_operand.hbm [shape: bf16[16,16], index: 2, kind: input, shape index: {}]   ;;  %s1761_s3 = inlined_call_operand.hbm [shape: bf16[16,16], index: 3, kind: input, shape index: {}]   ;;  %s1762_s4 = inlined_call_operand.hbm [shape: bf16[4,16,128], index: 4, kind: input, shape index: {}]   ;;  %s1763_s5 = inlined_call_operand.hbm [shape: bf16[4,16,16], index: 5, kind: input, shape index: {}]   ;;  %s1764_s6 = inlined_call_operand.vmem [shape: bf16[16,128], index: 6, kind: input, shape index: {}]   ;;  %s1765_s7 = inlined_call_operand.vmem [shape: f32[1,128], index: 7, kind: input, shape index: {}]   ;;  %s1766_s8 = inlined_call_operand.hbm [shape: f32[16,128], index: 8, kind: output, shape index: {}]   ;;  %s1767_s1 = inlined_call_operand.vmem [shape: s32[8], index: 1, kind: input, shape index: {}]  }
   0x1   :  { %1791 = sst [smem:[#allocation39_spill]] %s1760_s2  ;;  %s15_s10 = sshll.u32 %s1767_s1, 4  ;;  %s16_s10 = int_to_ptr.vmem [resolvable:$true] %s15_s10 }
   0x2   :  { %1792 = sst [smem:[#allocation40_spill]] %s1761_s3  ;;  %s1001_s11 = scalar_lea.vmem %s16_s10, 16 }
   0x3   :  { %1793 = sst [smem:[#allocation41_spill]] %s1762_s4  ;;  %p1002_p0 = scmp.ne.s32.totalorder %s16_s10, %s1001_s11 }
   0x4   :  { %1794 = sst [smem:[#allocation42_spill]] %s1763_s5  ;;  %p1006_p1 = scmp.lt.s32.totalorder %s16_s10, %s16_s10 }
   0x5   :  { %1795 = sst [smem:[#allocation43_spill]] %s1764_s6  ;;  %p1007_p2 = scmp.lt.s32.totalorder %s1001_s11, %s1001_s11 }
   0x6   :  { %1796 = sst [smem:[#allocation44_spill]] %s1765_s7 }
   0x7   :  { %1797 = sst [smem:[#allocation45_spill]] %s1766_s8  ;;  %p1008_p3 = por %p1007_p2, %p1006_p1 }
   0x8   :  { %14 = dma.hbm_to_smem %s1759_s0, 16, %s1283_s27, [#allocation2] }
   0x9   :  { %p1009_p4 = pnand %p1008_p3, %p1002_p0 }
   0xb   :  { %1012 = shalt.err (!%p1009_p4)  }
   0xc   :  { %s1284_s12 = smov [#allocation4]  }
   0xd   :  { %18 = dma.vmem_to_smem %s16_s10, 16, %s1284_s12, [#allocation2] }
   0xe   :  { %1205 = dma.done.wait [#allocation2], 32 }
   0xf   :  { %1206 = vsyncadd [#allocation2], 4294967264 }
  0x10   :  { %20 = sfence }
  0x11   :  { %21 = vsyncpa [#allocation6], 0 }
  0x12   :  { %22 = vsyncpa [#allocation9], 0 }
  0x13   :  { %24 = vsyncpa [#allocation9 + $0x1], 0 }
  0x14   :  { %25 = vsyncpa [#allocation12], 0 }
  0x15   :  { %27 = vsyncpa [#allocation12 + $0x1], 0 }
  0x16   :  { %28 = vsyncpa [#allocation7], 0 }
  0x17   :  { %30 = vsyncpa [#allocation7 + $0x1], 0  ;;  %s1347_s0 = smov 0   ;;  %s1349_s1 = smov 0  }
  0x18   :  { %s1351_s13 = smov 0   ;;  %s1353_s14 = smov 0  }
  0x19   :  { %s1355_s15 = smov 0   ;;  %s1357_s16 = smov 0  }
  0x1a   :  { %s1359_s17 = smov 0   ;;  %s1361_s18 = smov 0  }
  0x1b   :  { %s1363_s19 = smov 0   ;;  %s1365_s20 = smov 0  }
  0x1c   :  { %s1367_s21 = smov 0   ;;  %s1369_s22 = smov 0  }
  0x1d   :  { %s1371_s23 = smov 0   ;;  %s1373_s24 = smov 0  }
  0x1e LB: > { %1798 = sst [smem:[#allocation24_spill]] %s1249_s16  ;;  %s1418_s25 = sadd.s32 4294967295, %s1281_s24   ;;  %s1281_s24 = sphi %s1373_s24, %s36_s24   ;;  %s1277_s23 = sphi %s1371_s23, %s1880_s23   ;;  %s1273_s22 = sphi %s1369_s22, %s1867_s22   ;;  %s1269_s21 = sphi %s1367_s21, %s1879_s21   ;;  %s1265_s20 = sphi %s1365_s20, %s1878_s20   ;;  %s1261_s19 = sphi %s1363_s19, %s1865_s19   ;;  %s1257_s18 = sphi %s1361_s18, %s1877_s18   ;;  %s1253_s17 = sphi %s1359_s17, %s1876_s17   ;;  %s1249_s16 = sphi %s1357_s16, %s1875_s16   ;;  %s1245_s15 = sphi %s1355_s15, %s1874_s15   ;;  %s1241_s14 = sphi %s1353_s14, %s1873_s14   ;;  %s1237_s13 = sphi %s1351_s13, %s1872_s13   ;;  %s1233_s1 = sphi %s1349_s1, %s1871_s1   ;;  %s1229_s0 = sphi %s1347_s0, %s1870_s0  }
  0x1f   : > { %1799 = sst [smem:[#allocation25_spill]] %s1253_s17  ;;  %s767_s26 = sadd.s32 4294967294, %s1281_s24  }
  0x20   : > { %1800 = sst [smem:[#allocation26_spill]] %s1261_s19  ;;  %s51_s27 = sadd.s32 1, %s1273_s22 }
  0x21   : > { %1801 = sst [smem:[#allocation27_spill]] %s1265_s20  ;;  %p53_p5 = scmp.ge.s32.totalorder %s51_s27, 4 }
  0x22   : > { %1802 = sst [smem:[#allocation28_spill]] %s1269_s21  ;;  %s55_s28 = sadd.s32 1, %s1277_s23 }
  0x23   : > { %1803 = sst [smem:[#allocation29_spill]] %s1273_s22  ;;  %s88_s29 = sadd.s32 1, %s1261_s19 }
  0x24   : > { %p95_p6 = scmp.ne.s32.totalorder %s1261_s19, %s1257_s18  ;;  %s1882_s27 = smov (%p53_p5, %s51_s27), 0 }
  0x25   : > { %1804 = sst [smem:[#allocation30_spill]] %s1882_s27  ;;  %s1884_s28 = smov (!%p53_p5, %s55_s28), %s1277_s23 }
  0x26   : > { %p1779_p7 = scmp.eq.s32.totalorder %s1281_s24, 0  ;;  %p101_p8 = scmp.ne.s32.totalorder %s1257_s18, %s1253_s17 }
  0x27   : > { %p57_p9 = scmp.ge.s32.totalorder %s1884_s28, 2  ;;  %p1784_p10 = scmp.eq.s32.totalorder %s1418_s25, 0 }
  0x28   : > { %p233_p11 = scmp.eq.s32.totalorder %s1418_s25, 7  ;;  %p239_p12 = scmp.eq.s32.totalorder %s767_s26, 7 }
  0x29   : > { %s1886_s28 = smov (%p57_p9, %s1884_s28), 0  ;;  %p1441_p13 = por %p1784_p10, %p101_p8 }
  0x2a   : > { %1805 = sst [smem:[#allocation31_spill]] %s1886_s28  ;;  %p1448_p0 = por %p233_p11, %p95_p6 }
  0x2b   : > { %s1806_s30 = scalar_select %p1441_p13, 1, 0 }
  0x2c   : > { %s1808_s9 = scalar_select %p1448_p0, 1, 0 }
  0x2d   : > { %1807 = sst [smem:[#allocation32_spill]] %s1806_s30  ;;  %s1454_s10 = ssub.s32 %s1277_s23, %s1886_s28 }
  0x2e   : > { %1809 = sst [smem:[#allocation33_spill]] %s1808_s9  ;;  %s769_s11 = sshll.u32 %s1886_s28, 2 }
  0x2f   : > { %1810 = sst [smem:[#allocation34_spill]] %s1454_s10  ;;  %p86_p1 = scmp.eq.s32.totalorder %s1454_s10, 0 }
  0x30   : > { %s1459_s12 = sadd.s32 %s769_s11, %s1882_s27  ;;  %p1466_p2 = por %p1779_p7, %p95_p6 }
  0x31   : > { %p1473_p3 = por %p239_p12, %p101_p8  ;;  %s1481_s28 = sld [smem:[#allocation3 + %s1459_s12]] }
  0x32   : > { %s1478_s9 = scalar_select %p86_p1, %s1261_s19, %s88_s29  }
  0x33   : > { %s1812_s8 = scalar_select %p1473_p3, 1, 0 }
  0x34   : > { %1814 = sst [smem:[#allocation36_spill]] %s1478_s9  ;;  %p1780_p4 = scmp.lt.s32.totalorder %s1281_s24, 8 }
  0x35   : > { %1813 = sst [smem:[#allocation35_spill]] %s1812_s8  ;;  %s281_s11 = sand.u32 1, %s1281_s24  }
  0x36   : > { %s283_s21 = sand.u32 1, %s1261_s19   ;;  %s774_s6 = sshll.u32 %s1277_s23, 6 }
  0x37   : > { %s773_s7 = sshll.u32 %s283_s21, 2  ;;  %s1815_s3 = sld [smem:[#allocation40_spill]] }
  0x38   : > { %s285_s10 = scalar_lea.vmem [#allocation8], %s773_s7  ;;  %p1494_p5 = pnand %p1780_p4, %p1466_p2 }
  0x39   : > { %s292_s17 = sshll.u32 %s285_s10, 4  ;;  %s1498_s29 = scalar_lea.sflag [#allocation9], %s281_s11  ;;  %s293_s17 = int_to_ptr.vmem [resolvable:$true] %s292_s17 }
  0x3a   : > { %p1015_p6 = pneg %p1494_p5  ;;  %s1026_s21 = scalar_lea.vmem %s293_s17, 64 }
  0x3b   : > { %p1027_p8 = scmp.ne.s32.totalorder %s293_s17, %s1026_s21  ;;  %s1285_s20 = smov [#allocation8]  }
  0x3d   : > { %s290_s5 = scalar_lea.hbm %s1815_s3, %s774_s6  ;;  %p1029_p9 = pnand %p1027_p8, %p1015_p6 }
  0x3e   : > { %s1031_s6 = sshll.u32 %s1285_s20, 4  ;;  %s1032_s6 = int_to_ptr.vmem [resolvable:$false] %s1031_s6 }
  0x3f   : > { %p1030_p11 = pneg %p1029_p9  ;;  %s1033_s7 = scalar_lea.vmem %s1032_s6, 128 }
  0x40   : > { %p1034_p12 = scmp.lt.s32.totalorder %s293_s17, %s1032_s6  ;;  %p1035_p1 = scmp.lt.s32.totalorder %s1033_s7, %s1026_s21 }
  0x42   : > { %p1036_p7 = por %p1035_p1, %p1034_p12 }
  0x44   : > { %p1037_p2 = pnand %p1036_p7, %p1030_p11 }
  0x46   : > { %1040 = shalt.err (!%p1037_p2)
}
  0x47   : > { %850 = dma.hbm_to_vmem [thread:$0]  (!%p1494_p5), %s290_s5, 64, %s293_s17, %s1498_s29  }
  0x48   : > { %p770_p6 = scmp.ge.s32.totalorder %s1281_s24, 1  ;;  %p246_p8 = scmp.lt.s32.totalorder %s1281_s24, 9 }
  0x49   : > { %s1286_s30 = smov [#allocation5]   ;;  %s111_s11 = ssub.s32 %s1273_s22, %s1882_s27 }
  0x4a   : > { %s261_s10 = sshll.u32 %s1286_s30, 4  ;;  %p1507_p9 = pnand %p770_p6, %p246_p8  ;;  %s262_s10 = int_to_ptr.vmem [resolvable:$true] %s261_s10 }
  0x4b   : > { %p1521_p5 = scmp.eq.s32.totalorder %s111_s11, 0  ;;  %s1052_s17 = scalar_lea.vmem %s262_s10, 128 }
  0x4c   : > { %s1817_s26 = scalar_select %p1507_p9, 1, 0 }
  0x4d   : > { %p843_p7 = pneg %p1507_p9  ;;  %p1053_p1 = scmp.ne.s32.totalorder %s262_s10, %s1052_s17 }
  0x4e   : > { %p1060_p8 = scmp.lt.s32.totalorder %s262_s10, %s262_s10  ;;  %p1061_p4 = scmp.lt.s32.totalorder %s1052_s17, %s1052_s17 }
  0x4f   : > { %p1515_p11 = pnand %p843_p7, %p1784_p10 }
  0x50   : > { %p1062_p3 = por %p1061_p4, %p1060_p8 }
  0x51   : > { %p1043_p12 = pneg %p1515_p11 }
  0x53   : > { %p1055_p2 = pnand %p1053_p1, %p1043_p12 }
  0x55   : > { %p1056_p6 = pneg %p1055_p2 }
  0x57   : > { %p1063_p0 = pnand %p1062_p3, %p1056_p6 }
  0x59   : > { %1066 = shalt.err (!%p1063_p0)
}
  0x5a   : > { %s1287_s21 = smov 64   ;;  %s1288_s20 = smov 4  }
  0x5b   : > { %s1820_s2 = sld [smem:[#allocation39_spill]]  ;;  %s114_s30 = sadd.s32 1, %s1249_s16 }
  0x5c   : > { %p121_p0 = scmp.ne.s32.totalorder %s1249_s16, %s1245_s15  ;;  %p1822_p3 = scmp.eq.s32.totalorder %s1281_s24, 0 }
  0x5d   : > { %s1541_s11 = scalar_select %p1521_p5, %s1249_s16, %s114_s30  }
  0x5e   : > { %p123_p4 = por %p121_p0, %p1822_p3  ;;  %p127_p7 = scmp.ne.s32.totalorder %s1245_s15, %s1241_s14 }
  0x5f   : > { %1821 = sst [smem:[#allocation37_spill]] %s1541_s11  ;;  %s301_s17 = sand.u32 1, %s1249_s16  }
  0x60   : > { %s801_s3 = sshll.u32 %s1273_s22, 7  ;;  %p1551_p12 = por %p127_p7, %p1784_p10 }
  0x61   : > { %846 = dma.hbm_to_vmem [thread:$0]  (!%p1515_p11), %s1820_s2, 128, %s262_s10, [#allocation6], %s1287_s21, %s1287_s21, %s1288_s20  }
  0x62   : > { %s1823_s8 = scalar_select %p1551_p12, 1, 0 }
  0x63   : > { %s775_s27 = sshll.u32 %s301_s17, 3  ;;  %s1824_s4 = sld [smem:[#allocation41_spill]] }
  0x64   : > { %s303_s6 = scalar_lea.vmem [#allocation10], %s775_s27  ;;  %p1825_p11 = scmp.lt.s32.totalorder %s1281_s24, 8 }
  0x65   : > { %s310_s7 = sshll.u32 %s303_s6, 4  ;;  %s1289_s30 = smov [#allocation10]   ;;  %s311_s7 = int_to_ptr.vmem [resolvable:$true] %s310_s7 }
  0x66   : > { %p1560_p5 = pnand %p1825_p11, %p123_p4  ;;  %s1080_s14 = scalar_lea.vmem %s311_s7, 128 }
  0x67   : > { %p1081_p2 = scmp.ne.s32.totalorder %s311_s7, %s1080_s14  ;;  %s1085_s17 = sshll.u32 %s1289_s30, 4  ;;  %s1086_s17 = int_to_ptr.vmem [resolvable:$false] %s1085_s17 }
  0x68   : > { %p1069_p1 = pneg %p1560_p5  ;;  %s1087_s19 = scalar_lea.vmem %s1086_s17, 256 }
  0x69   : > { %s309_s10 = scalar_lea.hbm %s1824_s4, %s801_s3  ;;  %p1088_p0 = scmp.lt.s32.totalorder %s311_s7, %s1086_s17 }
  0x6a   : > { %p1083_p6 = pnand %p1081_p2, %p1069_p1  ;;  %p1089_p3 = scmp.lt.s32.totalorder %s1087_s19, %s1080_s14 }
  0x6c   : > { %p1084_p8 = pneg %p1083_p6  ;;  %p1090_p7 = por %p1089_p3, %p1088_p0 }
  0x6e   : > { %p1091_p10 = pnand %p1090_p7, %p1084_p8 }
  0x70   : > { %1094 = shalt.err (!%p1091_p10)
}
  0x71   : > { %s1827_s3 = sld [smem:[#allocation34_spill]]  ;;  %s768_s9 = sshll.u32 %s1277_s23, 2 }
  0x72   : > { %853 = dma.hbm_to_vmem [thread:$0]  (!%p1560_p5), %s309_s10, 128, %s311_s7, %s1498_s29, %s1287_s21, %s1287_s21, %s1288_s20  }
  0x73   : > { %s146_s27 = sld [smem:[#allocation4 + %s1459_s12]]  ;;  %s138_s6 = sadd.s32 %s1273_s22, %s768_s9 }
  0x74   : > { %p161_p10 = scmp.ne.s32.totalorder %s1237_s13, %s1233_s1  ;;  %s140_s5 = sld [smem:[#allocation3 + %s138_s6]] }
  0x75   : > { %p167_p4 = scmp.ne.s32.totalorder %s1233_s1, %s1229_s0  ;;  %s141_s14 = sld [smem:[#allocation4 + %s138_s6]] }
  0x76   : > { %p1828_p11 = scmp.eq.s32.totalorder %s1281_s24, 0  ;;  %p1830_p2 = scmp.eq.s32.totalorder %s1418_s25, 0 }
  0x77   : > { %p1832_p6 = scmp.lt.s32.totalorder %s1281_s24, 8  ;;  %s154_s20 = sadd.s32 1, %s1237_s13 }
  0x78   : > { %p1581_p1 = por %p161_p10, %p1828_p11  ;;  %p1587_p5 = por %p167_p4, %p1830_p2 }
  0x79   : > { %s320_s19 = sand.u32 1, %s1237_s13   ;;  %p1835_p3 = pmov %p1832_p6 }
  0x7a   : > { %s1831_s12 = scalar_select %p1587_p5, 1, 0 }
  0x7b   : > { %p1595_p8 = pnand %p1832_p6, %p1581_p1  ;;  %s147_s21 = ssub.s32 %s140_s5, %s1481_s28 }
  0x7c   : > { %s831_s29 = scalar_select %p1581_p1, [#allocation3], [#allocation14] }
  0x7d   : > { %s149_s10 = sor.u32 %s147_s21, %s1827_s3  ;;  %s150_s7 = ssub.s32 %s141_s14, %s146_s27 }
  0x7e   : > { %s151_s17 = sor.u32 %s150_s7, %s149_s10  ;;  %s1888_s6 = smov (!%p1581_p1, %s138_s6), 0 }
  0x7f   : > { %p152_p0 = scmp.eq.s32.totalorder %s151_s17, 0  ;;  %s1890_s29 = smov (!%p1835_p3, %s831_s29), [#allocation16] }
  0x80   : > { %p1836_p7 = pmov %p1835_p3  ;;  %s778_s4 = sshll.u32 %s320_s19, 2 }
  0x81   : > { %s1608_s9 = scalar_select %p152_p0, %s1237_s13, %s154_s20  }
  0x82   : > { %s1892_s6 = smov (!%p1836_p7, %s1888_s6), 0  ;;  %p1837_p10 = pmov %p1835_p3 }
  0x83   : > { %1834 = sst [smem:[#allocation38_spill]] %s1608_s9  ;;  %s324_s5 = scalar_lea.vmem [#allocation11], %s778_s4 }
  0x84   : > { %s833_s2 = scalar_select %p1581_p1, [#allocation4], [#allocation15] }
  0x85   : > { %s328_s28 = sld [smem:[%s1890_s29 + %s1892_s6]]  ;;  %s339_s14 = sshll.u32 %s324_s5, 4  ;;  %s1619_s14 = int_to_ptr.vmem [resolvable:$true] %s339_s14 }
  0x86   : > { %s1894_s2 = smov (!%p1837_p10, %s833_s2), [#allocation17]  ;;  %s1838_s22 = sld [smem:[#allocation42_spill]] }
  0x87   : > { %s329_s3 = sld [smem:[%s1894_s2 + %s1892_s6]]  ;;  %s321_s30 = scalar_lea.sflag [#allocation12], %s320_s19 }
  0x88   : > { %p1097_p11 = pneg %p1595_p8 }
  0x8b   : > { %s780_s27 = sshll.u32 %s328_s28, 1 }
  0x8c   : > { %s1839_s11 = smov %s1838_s22 }
  0x8d   : > { %s333_s21 = sadd.s32 %s1277_s23, %s329_s3  ;;  %s1100_s4 = scalar_lea.hbm %s1839_s11, 512 }
  0x8e   : > { %s335_s10 = sadd.s32 %s780_s27, %s333_s21 }
  0x8f   : > { %s781_s20 = sshll.u32 %s335_s10, 6 }
  0x90   : > { %s337_s16 = scalar_lea.hbm %s1838_s22, %s781_s20 }
  0x91   : > { %s1095_s9 = scalar_lea.hbm %s337_s16, 64  ;;  %p1101_p6 = scmp.lt.s32.totalorder %s337_s16, %s1839_s11 }
  0x92   : > { %p1096_p4 = scmp.ne.s32.totalorder %s337_s16, %s1095_s9  ;;  %p1102_p0 = scmp.lt.s32.totalorder %s1100_s4, %s1095_s9 }
  0x94   : > { %p1098_p1 = pnand %p1097_p11, %p1096_p4  ;;  %p1103_p3 = por %p1102_p0, %p1101_p6 }
  0x96   : > { %p1099_p2 = pneg %p1098_p1 }
  0x98   : > { %p1104_p7 = pnand %p1103_p3, %p1099_p2 }
  0x9a   : > { %1107 = shalt.err (!%p1104_p7)
}
  0x9b   : > { %s1108_s22 = scalar_lea.vmem %s1619_s14, 64  ;;  %s1290_s19 = smov [#allocation11]  }
  0x9c   : > { %p1109_p10 = scmp.ne.s32.totalorder %s1619_s14, %s1108_s22  ;;  %s1113_s3 = sshll.u32 %s1290_s19, 4  ;;  %s1114_s3 = int_to_ptr.vmem [resolvable:$false] %s1113_s3 }
  0x9d   : > { %s1115_s27 = scalar_lea.vmem %s1114_s3, 128  ;;  %p1116_p1 = scmp.lt.s32.totalorder %s1619_s14, %s1114_s3 }
  0x9e   : > { %p1111_p5 = pnand %p1109_p10, %p1097_p11  ;;  %p1117_p12 = scmp.lt.s32.totalorder %s1115_s27, %s1108_s22 }
  0xa0   : > { %p1112_p4 = pneg %p1111_p5  ;;  %p1118_p13 = por %p1117_p12, %p1116_p1 }
  0xa2   : > { %p1119_p9 = pnand %p1118_p13, %p1112_p4 }
  0xa4   : > { %1122 = shalt.err (!%p1119_p9)
}
  0xa5   : > { %860 = dma.hbm_to_vmem [thread:$0]  (!%p1595_p8), %s337_s16, 64, %s1619_s14, %s321_s30  }
  0xa6   : > { %p1840_p2 = scmp.ne.s32.totalorder %s1817_s26, 0 }
  0xa7   : > { %p1841_p6 = scmp.eq.s32.totalorder (!%p1840_p2), %s1418_s25, 0 }
  0xa8   : > { %348 = sbr.rel (%p1840_p2) target bundleno = 864 (0x360), region = 44 }
  0xad   : > { %1208 = dma.done.wait (%p1841_p6), [#allocation6], 128   ;;  %p1842_p5 = pmov %p1841_p6 }
  0xae   : > { %s1843_s9 = sld [smem:[#allocation32_spill]]  ;;  %s354_s5 = sand.u32 1, %s1418_s25  }
  0xaf   : > { %1210 = vsyncadd (%p1842_p5), [#allocation6], 4294967168  ;;  %s1646_s21 = sand.u32 1, %s1257_s18   ;;  %s355_s0 = scalar_lea.sflag [#allocation9], %s354_s5 }
  0xb0   : > { %s784_s10 = sshll.u32 %s1646_s21, 2 }
  0xb1   : > { %s358_s20 = scalar_lea.vmem [#allocation8], %s784_s10 }
  0xb4   : > { %p1844_p13 = scmp.ne.s32.totalorder %s1843_s9, 0 }
  0xb6   : > { %1212 = dma.done.wait (%p1844_p13), %s355_s0, 64  }
  0xb7   : > { %1214 = vsyncadd (%p1844_p13), %s355_s0, 4294967232  ;;  %s365_s16 = sand.u32 1, %s1245_s15   ;;  %p1845_p9 = scmp.ne.s32.totalorder %s1823_s8, 0 }
  0xb8   : > { %s1654_s26 = sshll.u32 %s365_s16, 3 }
  0xb9   : > { %s367_s14 = scalar_lea.vmem [#allocation10], %s1654_s26 }
  0xba   : > { %1216 = dma.done.wait (%p1845_p9), %s355_s0, 128  }
  0xbb   : > { %1218 = vsyncadd (%p1845_p9), %s355_s0, 4294967168  ;;  %s372_s25 = sand.u32 1, %s1233_s1   ;;  %p1846_p12 = scmp.ne.s32.totalorder %s1831_s12, 0 }
  0xbc   : > { %s1662_s7 = sshll.u32 %s372_s25, 2  ;;  %s373_s17 = scalar_lea.sflag [#allocation12], %s372_s25 }
  0xbd   : > { %s376_s30 = scalar_lea.vmem [#allocation11], %s1662_s7 }
  0xbe   : > { %1220 = dma.done.wait (%p1846_p12), %s373_s17, 64  }
  0xbf   : > { %1222 = vsyncadd (%p1846_p12), %s373_s17, 4294967232  ;;  %s1847_s2 = sld [smem:[#allocation27_spill]]  ;;  %s787_s6 = sshll.u32 %s1646_s21, 3 }
  0xc0   : > { %s1671_s4 = scalar_lea.vmem [#allocation13], %s787_s6 }
  0xc5   : > { %p422_p8 = scmp.eq.s32.totalorder %s1847_s2, 0 }
  0xc6   : > { %s1848_s28 = sld [smem:[#allocation43_spill]] (%p422_p8)  ;;  %v1291_v1 = vmov (%p422_p8), 0.0   ;;  %vm1292_vm0 = vmmov (%p422_p8), 0   ;;  %v428_v2 = vld [vmem:[%s358_s20] sm:$0xf] (%p422_p8)  ;;  %vm444_vm1 = vcmask (%p422_p8), 130048  }
  0xc7   : > { %427 = sbr.rel (!%p422_p8) target bundleno = 407 (0x197), region = 64  ;;  %809 = vmatprep.subr.bf16.mxu0 (%p422_p8), %v1291_v1  ;;  %811 = vmatprep.mubr.msk.bf16.mxu0 (%p422_p8), %vm1292_vm0, %v1291_v1  ;;  %s1849_s19 = sld [smem:[#allocation44_spill]] (%p422_p8) }
  0xcc   : > { %v990_v0 = vld [vmem:[%s1848_s28] sm:$0xff]  }
  0xcd   : > { %810 = vmatpush3.bf16.msra.mxu0 %v990_v0  ;;  %v789_v3 = vld [vmem:[%s1849_s19] ss:$0 sm:$0xff] }
  0xd0   : > { %812 = vmatmul.mubr.msk.bf16.vlgmr.msra.gmra.mxu0 %vm444_vm1, %v428_v2 }
 0x190   : > { %v482_v4 = vpop.f32.mrf.mxu0 }
 0x191   : > { %v483_v5 = vadd.f32 %v789_v3, %v482_v4 }
 0x192   : > { %v813_v6 = vpop.f32.mrf.mxu0 }
 0x193   : > { %488 = vst [vmem:[%s1671_s4] sm:$0xff] %v483_v5 }
 0x194   : > { %v485_v7 = vpop.f32.mrf.mxu0 }
 0x196   : > { %v814_v8 = vpop.f32.mrf.mxu0 }
 0x197 PF: > { %s1850_s3 = sld [smem:[#allocation28_spill]] }
 0x198   : > { %s1851_s27 = sld [smem:[#allocation27_spill]] }
 0x19d   : > { %s792_s9 = sshll.u32 %s1850_s3, 2 }
 0x19e   : > { %s490_s5 = sadd.s32 %s1851_s27, %s792_s9 }
 0x19f   : > { %s492_s10 = sld [smem:[#allocation3 + %s490_s5]] }
 0x1a0   : > { %s494_s0 = sld [smem:[#allocation4 + %s490_s5]] }
 0x1a5   : > { %p493_p11 = scmp.eq.s32.totalorder %s492_s10, %s1851_s27 }
 0x1a6   : > { %p495_p0 = scmp.eq.s32.totalorder %s494_s0, 0 }
 0x1a8   : > { %p496_p3 = pnand %p495_p0, %p493_p11 }
 0x1aa   : > { %499 = sbr.rel (%p496_p3) target bundleno = 837 (0x345), region = 68 }
 0x1af   : > { %v991_v9 = vld [vmem:[%s367_s14] sm:$0xff]   ;;  %v1293_v10 = vmov 0.0   ;;  %v992_v11 = vld [vmem:[#allocation5] sm:$0xff]   ;;  %vm1294_vm2 = vmmov 0   ;;  %vm515_vm3 = vcmask 130048   ;;  %v561_v18 = vld [vmem:[%s1671_s4] sm:$0xff] }
 0x1b0   : > { %815 = vmatprep.subr.bf16.mxu0 %v1293_v10  ;;  %821 = vmatprep.subr.bf16.mxu1 %v1293_v10  ;;  %v562_v17 = vld [vmem:[%s376_s30] sm:$0xf] }
 0x1b1   : > { %816 = vmatpush3.bf16.msra.mxu0 %v991_v9  ;;  %817 = vmatprep.mubr.msk.bf16.mxu0 %vm1294_vm2, %v1293_v10 }
 0x1b2   : > { %823 = vmatprep.mubr.msk.bf16.mxu1 %vm1294_vm2, %v1293_v10 }
 0x1b4   : > { %818 = vmatmul.mubr.msk.bf16.vlgmr.msra.gmra.mxu0 %vm515_vm3, %v992_v11 }
 0x274   : > { %v553_v12 = vpop.f32.mrf.mxu0 }
 0x276   : > { %v819_v13 = vpop.f32.mrf.mxu0 }
 0x278   : > { %v556_v14 = vpop.f32.mrf.mxu0 }
 0x279   : > { %v560_v15 = vpack.c.bf16 %v556_v14, %v553_v12 }
 0x27a   : > { %v820_v16 = vpop.f32.mrf.mxu0 }
 0x27b   : > { %822 = vmatpush3.bf16.msra.mxu1 %v560_v15 }
 0x27e   : > { %824 = vmatmul.mubr.msk.bf16.vlgmr.msra.gmra.mxu1 %vm515_vm3, %v562_v17 }
 0x33e   : > { %v600_v19 = vpop.f32.mrf.mxu1 }
 0x33f   : > { %v606_v20 = vadd.f32 %v600_v19, %v561_v18 }
 0x340   : > { %v825_v21 = vpop.f32.mrf.mxu1 }
 0x341   : > { %607 = vst [vmem:[%s1671_s4] sm:$0xff] %v606_v20 }
 0x342   : > { %v603_v22 = vpop.f32.mrf.mxu1 }
 0x344   : > { %v826_v23 = vpop.f32.mrf.mxu1 }
 0x345 PF: > { %s1852_s20 = sld [smem:[#allocation28_spill]]  ;;  %s622_s7 = sshll.u32 %s1671_s4, 4  ;;  %s623_s7 = int_to_ptr.vmem [resolvable:$true] %s622_s7 }
 0x346   : > { %s1853_s16 = sld [smem:[#allocation33_spill]]  ;;  %s609_s30 = scalar_lea.sflag [#allocation7], %s1646_s21 }
 0x347   : > { %s1854_s17 = sld [smem:[#allocation45_spill]]  ;;  %s1123_s8 = scalar_lea.vmem %s623_s7, 128 }
 0x348   : > { %p1124_p7 = scmp.ne.s32.totalorder %s623_s7, %s1123_s8  ;;  %s1295_s29 = smov [#allocation13]  }
 0x349   : > { %s1127_s28 = sshll.u32 %s1295_s29, 4  ;;  %s1128_s28 = int_to_ptr.vmem [resolvable:$false] %s1127_s28 }
 0x34a   : > { %s1129_s12 = scalar_lea.vmem %s1128_s28, 256  ;;  %p1130_p2 = scmp.lt.s32.totalorder %s623_s7, %s1128_s28 }
 0x34b   : > { %s798_s26 = sshll.u32 %s1852_s20, 7  ;;  %p1131_p6 = scmp.lt.s32.totalorder %s1129_s12, %s1123_s8 }
 0x34c   : > { %p1856_p10 = scmp.ne.s32.totalorder %s1853_s16, 0 }
 0x34d   : > { %s1855_s2 = smov %s1854_s17  ;;  %s620_s6 = scalar_lea.hbm %s1854_s17, %s798_s26 }
 0x34e   : > { %p1125_p4 = pnand %p1124_p7, %p1856_p10  ;;  %p1132_p5 = por %p1131_p6, %p1130_p2 }
 0x350   : > { %p1126_p1 = pneg %p1125_p4 }
 0x352   : > { %p1133_p13 = pnand %p1132_p5, %p1126_p1 }
 0x354   : > { %1136 = shalt.err (!%p1133_p13)
}
 0x355   : > { %s1137_s22 = scalar_lea.hbm %s620_s6, 128  ;;  %s1141_s19 = scalar_lea.hbm %s1855_s2, 256 }
 0x356   : > { %p1138_p9 = scmp.ne.s32.totalorder %s620_s6, %s1137_s22  ;;  %p1142_p11 = scmp.lt.s32.totalorder %s620_s6, %s1855_s2 }
 0x357   : > { %p1143_p0 = scmp.lt.s32.totalorder %s1141_s19, %s1137_s22 }
 0x358   : > { %p1139_p12 = pnand %p1138_p9, %p1856_p10 }
 0x359   : > { %p1144_p3 = por %p1143_p0, %p1142_p11 }
 0x35a   : > { %p1140_p8 = pneg %p1139_p12 }
 0x35c   : > { %p1145_p7 = pnand %p1144_p3, %p1140_p8 }
 0x35e   : > { %1148 = shalt.err (!%p1145_p7)
}
 0x35f   : > { %841 = dma.vmem_to_hbm [thread:$0]  (%p1856_p10), %s623_s7, 128, %s620_s6, %s609_s30  }
 0x360 PF: > { %s1857_s9 = sld [smem:[#allocation25_spill]]  ;;  %p868_p4 = scmp.ge.s32.totalorder %s1281_s24, 2 }
 0x361   : > { %s1858_s5 = sld [smem:[#allocation35_spill]] }
 0x366   : > { %s634_s10 = sand.u32 1, %s1857_s9  }
 0x367   : > { %p1859_p1 = scmp.ne.s32.totalorder %s1858_s5, 0  ;;  %s635_s0 = scalar_lea.sflag [#allocation7], %s634_s10 }
 0x369   : > { %p862_p2 = pnand %p868_p4, %p1859_p1 }
 0x36b   : > { %p863_p6 = pneg %p862_p2 }
 0x36d   : > { %1224 = dma.done.wait (%p863_p6), %s635_s0, 128  }
 0x36e   : > { %1226 = vsyncadd (%p863_p6), %s635_s0, 4294967168  ;;  %s36_s24 = sadd.s32 1, %s1281_s24   ;;  %s1861_s16 = sld [smem:[#allocation38_spill]] }
 0x36f   : > { %p1712_p5 = scmp.ge.s32.totalorder %s36_s24, 10   ;;  %s1862_s26 = sld [smem:[#allocation24_spill]] }
 0x370   : > { %s1863_s25 = sld [smem:[#allocation37_spill]]  ;;  %s1870_s0 = smov %s1233_s1 }
 0x371   : > { %s1864_s6 = sld [smem:[#allocation26_spill]]  ;;  %s1871_s1 = smov %s1237_s13 }
 0x372   : > { %s1865_s19 = sld [smem:[#allocation36_spill]]  ;;  %s1873_s14 = smov %s1245_s15 }
 0x373   : > { %s1866_s7 = sld [smem:[#allocation29_spill]]  ;;  %s1876_s17 = smov %s1257_s18 }
 0x374   : > { %s1867_s22 = sld [smem:[#allocation30_spill]]  ;;  %s1872_s13 = smov %s1861_s16 }
 0x375   : > { %s1868_s30 = sld [smem:[#allocation31_spill]]  ;;  %s1874_s15 = smov %s1862_s26 }
 0x376   : > { %s1875_s16 = smov %s1863_s25  ;;  %s1879_s21 = smov %s1277_s23 }
 0x377   : > { %s1877_s18 = smov %s1864_s6  ;;  %35 = sbr.rel (!%p1712_p5) target bundleno = 30 (0x1e), region = 127 }
 0x379   : > { %s1878_s20 = smov %s1866_s7 }
 0x37b   : > { %s1880_s23 = smov %s1868_s30 }
 0x37c   :  { %640 = vsyncpa [#allocation6], 1 }
 0x37d   :  { %642 = vsyncpa [#allocation6 + $0x1], 1 }
 0x37e   :  { %643 = vsyncpa [#allocation9], 1 }
 0x37f   :  { %645 = vsyncpa [#allocation9 + $0x1], 1 }
 0x380   :  { %646 = vsyncpa [#allocation12], 1 }
 0x381   :  { %648 = vsyncpa [#allocation12 + $0x1], 1 }
 0x382   :  { %649 = vsyncpa [#allocation7], 1 }
 0x383   :  { %651 = vsyncpa [#allocation7 + $0x1], 1 }

</bundles_post_ra>
